<compile_context>
chip_gen: v7x
topology: tpu7x:2x2x1
jax: 0.10.0
libtpu: 0.0.40
codegen_flags: <defaults>
</compile_context>

<pallas_src>
import functools

import numpy as np
import jax
import jax.numpy as jnp
from jax import lax
from jax.experimental import pallas as pl
from jax.experimental.pallas import tpu as pltpu


def _focal_loss_kernel(logits_ref, labels_ref, alpha_ref, out_ref, *,
                       num_classes, gamma, inv_scale):
    i = pl.program_id(1)  # inner ("arbitrary") axis over N-tiles

    @pl.when(i == 0)
    def _init():
        out_ref[...] = jnp.zeros_like(out_ref)

    lab = labels_ref[...]                 # (1, TN) int32, -1 marks padded rows
    valid = lab >= 0

    # Load each class row directly (C is small & static) -> (1, TN) f32 rows.
    rows = [logits_ref[ci:ci + 1, :].astype(jnp.float32) for ci in range(num_classes)]

    # log-softmax over the class axis, unrolled on the VPU (no cross-lane XLU work).
    m = rows[0]
    for ci in range(1, num_classes):
        m = jnp.maximum(m, rows[ci])                          # (1, TN)
    z_rows = [r - m for r in rows]                            # shifted logits
    s = jnp.exp(z_rows[0])
    for ci in range(1, num_classes):
        s = s + jnp.exp(z_rows[ci])
    log_s = jnp.log(s)                                        # (1, TN)

    # gather(1, labels) on log-softmax + alpha gather, as unrolled per-class selects.
    z_sel = jnp.zeros_like(m)
    a_sel = jnp.zeros_like(m)
    for ci in range(num_classes):
        hit = lab == ci                                       # (1, TN)
        z_sel = jnp.where(hit, z_rows[ci], z_sel)
        a_sel = jnp.where(hit, alpha_ref[ci:ci + 1, :], a_sel)
    logp_t = z_sel - log_s                                    # log softmax at label
    p_t = jnp.exp(logp_t)                                     # softmax at label

    one_minus = 1.0 - p_t
    g = float(gamma)
    if g.is_integer() and 0.0 <= g <= 8.0:
        # integer gamma -> repeated multiplies (gamma=2 default is a single square);
        # keeps the single EUP slot free for the softmax exp/log.
        w = jnp.ones_like(one_minus)
        for _ in range(int(g)):
            w = w * one_minus
    else:
        w = jnp.power(one_minus, jnp.float32(g))

    loss = jnp.where(valid, a_sel * w * (-logp_t), 0.0)       # (1, TN)
    partial = jnp.sum(loss)                                   # scalar per tile

    lane = lax.broadcasted_iota(jnp.int32, out_ref.shape, 1)  # (1, 128)
    out_ref[...] = out_ref[...] + jnp.where(lane == 0, partial, 0.0)

    @pl.when(i == pl.num_programs(1) - 1)
    def _finalize():
        out_ref[...] = out_ref[...] * jnp.float32(inv_scale)


def focal_loss(logits, labels, alpha_vec, gamma=2.0, size_average=True,
               block_n=8192, num_splits=2):
    """logits: (..., C); labels: (..., C) one-hot/scores OR (...) class indices;
    alpha_vec: (C,). Returns a scalar focal loss (mean if size_average else sum)."""
    c = logits.shape[-1]
    logits2d = logits.reshape(-1, c)          # keep native dtype; cast happens in-kernel
    n = logits2d.shape[0]

    # TODO(synk): the PyTorch module keys the "labels are already indices" branch on
    #             `len(labels) < 2` (batch size); here we key on rank instead.
    if labels.ndim == logits.ndim:
        lab_idx = jnp.argmax(labels.reshape(-1, labels.shape[-1]), axis=-1)
    else:
        lab_idx = labels.reshape(-1)
    lab_idx = lab_idx.astype(jnp.int32)

    # Tile width: clamp to the (lane-rounded) batch so tiny inputs don't over-pad,
    # round to a multiple of 128 lanes.
    n_lanes = ((n + 127) // 128) * 128
    block_n = max(128, min(int(block_n), n_lanes))
    block_n = ((block_n + 127) // 128) * 128

    n_tiles = -(-n // block_n)
    num_splits = max(1, min(int(num_splits), n_tiles))
    tiles_per_split = -(-n_tiles // num_splits)
    n_pad = num_splits * tiles_per_split * block_n

    logits_t = jnp.swapaxes(logits2d, 0, 1)                       # (C, N), lane-dense
    logits_t = jnp.pad(logits_t, ((0, 0), (0, n_pad - n)))
    lab2d = jnp.pad(lab_idx, (0, n_pad - n), constant_values=-1).reshape(1, n_pad)
    alpha2d = alpha_vec.reshape(c, 1).astype(jnp.float32)

    inv_scale = (1.0 / float(n)) if size_average else 1.0

    itemsize = jnp.dtype(logits.dtype).itemsize
    cost = pl.CostEstimate(
        flops=12 * n_pad * c,
        transcendentals=n_pad * (c + 2),
        bytes_accessed=n_pad * c * itemsize + n_pad * 4 + c * 4 + num_splits * 128 * 4,
    )

    kernel = functools.partial(
        _focal_loss_kernel, num_classes=c, gamma=float(gamma), inv_scale=float(inv_scale)
    )
    out = pl.pallas_call(
        kernel,
        out_shape=jax.ShapeDtypeStruct((1, num_splits * 128), jnp.float32),
        grid=(num_splits, tiles_per_split),
        in_specs=[
            pl.BlockSpec((c, block_n), lambda s, i: (0, s * tiles_per_split + i)),
            pl.BlockSpec((1, block_n), lambda s, i: (0, s * tiles_per_split + i)),
            pl.BlockSpec((c, 1), lambda s, i: (0, 0)),
        ],
        out_specs=pl.BlockSpec((1, 128), lambda s, i: (0, s)),
        compiler_params=pltpu.CompilerParams(
            dimension_semantics=("parallel", "arbitrary")),
        cost_estimate=cost,
    )(logits_t, lab2d, alpha2d)
    # Non-lane-0 entries are zero; each split's lane 0 holds its scaled partial.
    return jnp.sum(out)


if __name__ == "__main__":
    # Mirrors FocalLoss.__init__(alpha=0.25, gamma=2, num_classes=3)
    num_classes = 3
    alpha_scalar = 0.25
    gamma = 2.0
    alpha_vec = jnp.zeros((num_classes,), jnp.float32)
    alpha_vec = alpha_vec.at[0].add(alpha_scalar)
    alpha_vec = alpha_vec.at[1:].add(1.0 - alpha_scalar)      # [0.25, 0.75, 0.75]

    def reference(logits, lab_idx, alpha_v, gma, size_average):
        p = jax.nn.softmax(logits.astype(jnp.float32), axis=-1)
        logp = jnp.log(p)
        pt = jnp.take_along_axis(p, lab_idx[:, None], axis=1)[:, 0]
        lpt = jnp.take_along_axis(logp, lab_idx[:, None], axis=1)[:, 0]
        at = alpha_v[lab_idx]
        per = at * -((1.0 - pt) ** gma) * lpt
        return jnp.mean(per) if size_average else jnp.sum(per)

    key = jax.random.PRNGKey(0)

    # Case 1: tiny batch with one-hot labels (module default use), single tile.
    k1, k2 = jax.random.split(key)
    n1 = 8
    logits1 = jax.random.normal(k1, (n1, num_classes), jnp.float32)
    idx1 = jax.random.randint(k2, (n1,), 0, num_classes)
    onehot1 = jax.nn.one_hot(idx1, num_classes, dtype=jnp.float32)
    out1 = jax.block_until_ready(
        focal_loss(logits1, onehot1, alpha_vec, gamma=gamma, size_average=True))
    ref1 = reference(logits1, idx1, alpha_vec, gamma, True)
    assert np.allclose(np.asarray(out1), np.asarray(ref1), rtol=1e-5, atol=1e-6), (out1, ref1)

    # Case 2: larger batch exercising multi-tile pipelining, 2-way parallel split,
    # and row padding/masking (small block_n forces several inner-grid steps).
    k3, k4 = jax.random.split(k2)
    n2 = 1000
    logits2 = jax.random.normal(k3, (n2, num_classes), jnp.float32)
    idx2 = jax.random.randint(k4, (n2,), 0, num_classes)
    onehot2 = jax.nn.one_hot(idx2, num_classes, dtype=jnp.float32)
    out2 = jax.block_until_ready(
        focal_loss(logits2, onehot2, alpha_vec, gamma=gamma, size_average=True,
                   block_n=256, num_splits=2))
    ref2 = reference(logits2, idx2, alpha_vec, gamma, True)
    assert np.allclose(np.asarray(out2), np.asarray(ref2), rtol=1e-5, atol=1e-5), (out2, ref2)

    # Case 3: sum reduction (size_average=False), default (large, clamped) tile.
    out3 = jax.block_until_ready(
        focal_loss(logits2, onehot2, alpha_vec, gamma=gamma, size_average=False))
    ref3 = reference(logits2, idx2, alpha_vec, gamma, False)
    assert np.allclose(np.asarray(out3), np.asarray(ref3), rtol=1e-5, atol=1e-4), (out3, ref3)

    print("KERNEL_OK")
</pallas_src>

<mosaic_0001>
module attributes {stable_mosaic.version = 11 : i64} {
  func.func @_focal_loss_kernel(%arg0: i32, %arg1: i32, %arg2: memref<3x128xf32, #tpu.memory_space<vmem>>, %arg3: memref<1x128xi32, #tpu.memory_space<vmem>>, %arg4: memref<3x1xf32, #tpu.memory_space<vmem>>, %arg5: memref<1x128xf32, #tpu.memory_space<vmem>>) attributes {dimension_semantics = [#tpu.dimension_semantics<parallel>, #tpu.dimension_semantics<arbitrary>], iteration_bounds = array<i64: 1, 1>, scalar_prefetch = 0 : i64, scratch_operands = 0 : i64, tpu.core_type = #tpu.core_type<tc>, window_params = [{transform_indices = @transform_0, window_bounds = array<i64: 3, 128>}, {transform_indices = @transform_1, window_bounds = array<i64: 1, 128>}, {pipeline_mode = #tpu.pipeline_mode<synchronous>, transform_indices = @transform_2, window_bounds = array<i64: 3, 1>}, {transform_indices = @transform_3, window_bounds = array<i64: 1, 128>}]} {
    %c0_i32 = arith.constant 0 : i32
    %0 = arith.cmpi eq, %arg1, %c0_i32 : i32
    %1 = arith.extui %0 : i1 to i32
    %c0_i32_0 = arith.constant 0 : i32
    %2 = arith.cmpi ne, %1, %c0_i32_0 : i32
    scf.if %2 {
      %cst_28 = arith.constant 0.000000e+00 : f32
      %72 = vector.broadcast %cst_28 : f32 to vector<1x128xf32>
      %c0_29 = arith.constant 0 : index
      %c0_30 = arith.constant 0 : index
      %73 = vector.load %arg5[%c0_29, %c0_30] : memref<1x128xf32, #tpu.memory_space<vmem>>, vector<1x128xf32>
      tpu.vector_store %arg5[%c0_29, %c0_30], %72 {strides = array<i32>} : memref<1x128xf32, #tpu.memory_space<vmem>>, vector<1x128xf32>,
    } else {
    }
    %c0 = arith.constant 0 : index
    %c0_1 = arith.constant 0 : index
    %3 = vector.load %arg3[%c0, %c0_1] : memref<1x128xi32, #tpu.memory_space<vmem>>, vector<1x128xi32>
    %c0_i32_2 = arith.constant 0 : i32
    %4 = vector.broadcast %c0_i32_2 : i32 to vector<1x128xi32>
    %5 = arith.cmpi sge, %3, %4 : vector<1x128xi32>
    %c0_3 = arith.constant 0 : index
    %c0_4 = arith.constant 0 : index
    %6 = vector.load %arg2[%c0_3, %c0_4] : memref<3x128xf32, #tpu.memory_space<vmem>>, vector<1x128xf32>
    %c1 = arith.constant 1 : index
    %c0_5 = arith.constant 0 : index
    %7 = vector.load %arg2[%c1, %c0_5] : memref<3x128xf32, #tpu.memory_space<vmem>>, vector<1x128xf32>
    %c2 = arith.constant 2 : index
    %c0_6 = arith.constant 0 : index
    %8 = vector.load %arg2[%c2, %c0_6] : memref<3x128xf32, #tpu.memory_space<vmem>>, vector<1x128xf32>
    %9 = arith.maximumf %6, %7 : vector<1x128xf32>
    %10 = arith.maximumf %9, %8 : vector<1x128xf32>
    %11 = arith.subf %6, %10 : vector<1x128xf32>
    %12 = arith.subf %7, %10 : vector<1x128xf32>
    %13 = arith.subf %8, %10 : vector<1x128xf32>
    %14 = math.exp %11 : vector<1x128xf32>
    %15 = math.exp %12 : vector<1x128xf32>
    %16 = arith.addf %14, %15 : vector<1x128xf32>
    %17 = math.exp %13 : vector<1x128xf32>
    %18 = arith.addf %16, %17 : vector<1x128xf32>
    %19 = math.log %18 : vector<1x128xf32>
    %cst = arith.constant 0.000000e+00 : f32
    %20 = vector.broadcast %cst : f32 to vector<1x128xf32>
    %cst_7 = arith.constant 0.000000e+00 : f32
    %21 = vector.broadcast %cst_7 : f32 to vector<1x128xf32>
    %c0_i32_8 = arith.constant 0 : i32
    %22 = vector.broadcast %c0_i32_8 : i32 to vector<1x128xi32>
    %23 = arith.cmpi eq, %3, %22 : vector<1x128xi32>
    %24 = arith.select %23, %11, %20 : vector<1x128xi1>, vector<1x128xf32>
    %c0_9 = arith.constant 0 : index
    %c0_10 = arith.constant 0 : index
    %25 = vector.load %arg4[%c0_9, %c0_10] : memref<3x1xf32, #tpu.memory_space<vmem>>, vector<1x1xf32>
    %26 = vector.shape_cast %25 : vector<1x1xf32> to vector<1x1xf32>
    %27 = vector.broadcast %26 : vector<1x1xf32> to vector<1x128xf32>
    %28 = arith.select %23, %27, %21 : vector<1x128xi1>, vector<1x128xf32>
    %c1_i32 = arith.constant 1 : i32
    %29 = vector.broadcast %c1_i32 : i32 to vector<1x128xi32>
    %30 = arith.cmpi eq, %3, %29 : vector<1x128xi32>
    %31 = arith.select %30, %12, %24 : vector<1x128xi1>, vector<1x128xf32>
    %c1_11 = arith.constant 1 : index
    %c0_12 = arith.constant 0 : index
    %32 = vector.load %arg4[%c1_11, %c0_12] : memref<3x1xf32, #tpu.memory_space<vmem>>, vector<1x1xf32>
    %33 = vector.shape_cast %32 : vector<1x1xf32> to vector<1x1xf32>
    %34 = vector.broadcast %33 : vector<1x1xf32> to vector<1x128xf32>
    %35 = arith.select %30, %34, %28 : vector<1x128xi1>, vector<1x128xf32>
    %c2_i32 = arith.constant 2 : i32
    %36 = vector.broadcast %c2_i32 : i32 to vector<1x128xi32>
    %37 = arith.cmpi eq, %3, %36 : vector<1x128xi32>
    %38 = arith.select %37, %13, %31 : vector<1x128xi1>, vector<1x128xf32>
    %c2_13 = arith.constant 2 : index
    %c0_14 = arith.constant 0 : index
    %39 = vector.load %arg4[%c2_13, %c0_14] : memref<3x1xf32, #tpu.memory_space<vmem>>, vector<1x1xf32>
    %40 = vector.shape_cast %39 : vector<1x1xf32> to vector<1x1xf32>
    %41 = vector.broadcast %40 : vector<1x1xf32> to vector<1x128xf32>
    %42 = arith.select %37, %41, %35 : vector<1x128xi1>, vector<1x128xf32>
    %43 = arith.subf %38, %19 : vector<1x128xf32>
    %44 = math.exp %43 : vector<1x128xf32>
    %cst_15 = arith.constant 1.000000e+00 : f32
    %45 = vector.broadcast %cst_15 : f32 to vector<1x128xf32>
    %46 = arith.subf %45, %44 : vector<1x128xf32>
    %cst_16 = arith.constant 1.000000e+00 : f32
    %47 = vector.broadcast %cst_16 : f32 to vector<1x128xf32>
    %48 = arith.mulf %47, %46 : vector<1x128xf32>
    %49 = arith.mulf %48, %46 : vector<1x128xf32>
    %50 = arith.mulf %42, %49 : vector<1x128xf32>
    %cst_17 = arith.constant 0.000000e+00 : f32
    %51 = vector.broadcast %cst_17 : f32 to vector<1x128xf32>
    %52 = arith.subf %51, %43 : vector<1x128xf32>
    %53 = arith.mulf %50, %52 : vector<1x128xf32>
    %cst_18 = arith.constant 0.000000e+00 : f32
    %54 = vector.broadcast %cst_18 : f32 to vector<1x128xf32>
    %55 = arith.select %5, %53, %54 : vector<1x128xi1>, vector<1x128xf32>
    %56 = vector.shape_cast %55 : vector<1x128xf32> to vector<1x1x128xf32>
    %cst_19 = arith.constant dense<0.000000e+00> : vector<1xf32>
    %57 = vector.multi_reduction <add>, %56, %cst_19 [1, 2] : vector<1x1x128xf32> to vector<1xf32>
    %58 = vector.shape_cast %57 : vector<1xf32> to vector<1x1x1xf32>
    %59 = vector.extract %58[0, 0, 0] : f32 from vector<1x1x1xf32>
    %60 = tpu.iota {dimensions = array<i32: 1>} : vector<1x128xi32>
    %c0_20 = arith.constant 0 : index
    %c0_21 = arith.constant 0 : index
    %61 = vector.load %arg5[%c0_20, %c0_21] : memref<1x128xf32, #tpu.memory_space<vmem>>, vector<1x128xf32>
    %c0_i32_22 = arith.constant 0 : i32
    %62 = vector.broadcast %c0_i32_22 : i32 to vector<1x128xi32>
    %63 = arith.cmpi eq, %60, %62 : vector<1x128xi32>
    %cst_23 = arith.constant 0.000000e+00 : f32
    %64 = vector.broadcast %59 : f32 to vector<1x128xf32>
    %65 = vector.broadcast %cst_23 : f32 to vector<1x128xf32>
    %66 = arith.select %63, %64, %65 : vector<1x128xi1>, vector<1x128xf32>
    %67 = arith.addf %61, %66 : vector<1x128xf32>
    %c0_24 = arith.constant 0 : index
    %c0_25 = arith.constant 0 : index
    %68 = vector.load %arg5[%c0_24, %c0_25] : memref<1x128xf32, #tpu.memory_space<vmem>>, vector<1x128xf32>
    tpu.vector_store %arg5[%c0_24, %c0_25], %67 {strides = array<i32>} : memref<1x128xf32, #tpu.memory_space<vmem>>, vector<1x128xf32>,
    %c0_i32_26 = arith.constant 0 : i32
    %69 = arith.cmpi eq, %arg1, %c0_i32_26 : i32
    %70 = arith.extui %69 : i1 to i32
    %c0_i32_27 = arith.constant 0 : i32
    %71 = arith.cmpi ne, %70, %c0_i32_27 : i32
    scf.if %71 {
      %c0_28 = arith.constant 0 : index
      %c0_29 = arith.constant 0 : index
      %72 = vector.load %arg5[%c0_28, %c0_29] : memref<1x128xf32, #tpu.memory_space<vmem>>, vector<1x128xf32>
      %cst_30 = arith.constant 1.250000e-01 : f32
      %73 = vector.broadcast %cst_30 : f32 to vector<1x128xf32>
      %74 = arith.mulf %72, %73 : vector<1x128xf32>
      %c0_31 = arith.constant 0 : index
      %c0_32 = arith.constant 0 : index
      %75 = vector.load %arg5[%c0_31, %c0_32] : memref<1x128xf32, #tpu.memory_space<vmem>>, vector<1x128xf32>
      tpu.vector_store %arg5[%c0_31, %c0_32], %74 {strides = array<i32>} : memref<1x128xf32, #tpu.memory_space<vmem>>, vector<1x128xf32>,
    } else {
    }
    return
  }
  func.func @transform_0(%arg0: i32, %arg1: i32) -> (i32, i32) {
    %c1_i32 = arith.constant 1 : i32
    %0 = arith.muli %arg0, %c1_i32 : i32
    %1 = arith.addi %0, %arg1 : i32
    %c0_i32 = arith.constant 0 : i32
    %c0_i32_0 = arith.constant 0 : i32
    return %c0_i32, %1 : i32, i32
  }
  func.func @transform_1(%arg0: i32, %arg1: i32) -> (i32, i32) {
    %c1_i32 = arith.constant 1 : i32
    %0 = arith.muli %arg0, %c1_i32 : i32
    %1 = arith.addi %0, %arg1 : i32
    %c0_i32 = arith.constant 0 : i32
    %c0_i32_0 = arith.constant 0 : i32
    return %c0_i32, %1 : i32, i32
  }
  func.func @transform_2(%arg0: i32, %arg1: i32) -> (i32, i32) {
    %c0_i32 = arith.constant 0 : i32
    %c0_i32_0 = arith.constant 0 : i32
    %c0_i32_1 = arith.constant 0 : i32
    return %c0_i32, %c0_i32_0 : i32, i32
  }
  func.func @transform_3(%arg0: i32, %arg1: i32) -> (i32, i32) {
    %c0_i32 = arith.constant 0 : i32
    %c0_i32_0 = arith.constant 0 : i32
    return %c0_i32, %arg0 : i32, i32
  }
}

</mosaic_0001>

<bundles_post_ra>
// kernel: tpu_custom_call.1
= control target key start
LH: loop header
LB: loop body
LE: loop exit
PB: predicated region body
PF: predicated region fallthrough
CT: control target
= control target key end

     0   :  { %v196_v1 = vmov 0   ;;  %s256_s0 = inlined_call_operand.vmem [shape: f32[3,128], index: 0, kind: input, shape index: {}]   ;;  %s257_s1 = inlined_call_operand.vmem [shape: s32[1,128], index: 1, kind: input, shape index: {}]   ;;  %s258_s2 = inlined_call_operand.vmem [shape: f32[3,1], index: 2, kind: input, shape index: {}]   ;;  %s259_s3 = inlined_call_operand.hbm [shape: f32[1,128], index: 3, kind: output, shape index: {}]  }
   0x1   :  { %v73_v0 = vld [vmem:[%s258_s2] sm:$0x1]  ;;  %160 = vset.pattern.permute.xlu0 %v196_v1  ;;  %161 = vset.pattern.permute.xlu1 %v196_v1  ;;  %v91_v2 = vld [vmem:[%s258_s2 + $0x2] sm:$0x1]  ;;  %v82_v3 = vld [vmem:[%s258_s2 + $0x1] sm:$0x1] }
   0x2   :  { %76 = vperm.xlu0 %160, %v73_v0   ;;  %94 = vperm.xlu1 %161, %v91_v2  }
   0x3   :  { %8 = vsyncpa [#allocation3], 0  ;;  %v53_v4 = vld [vmem:[%s256_s0] sm:$0x1]  ;;  %v54_v5 = vld [vmem:[%s256_s0 + $0x1] sm:$0x1]  ;;  %v118_v50 = vlaneseq }
   0x4   :  { %v56_v6 = vmax.f32 %v53_v4, %v54_v5  ;;  %v55_v7 = vld [vmem:[%s256_s0 + $0x2] sm:$0x1]  ;;  %v51_v20 = vld [vmem:[%s257_s1] sm:$0x1]  ;;  %vm107_vm4 = vcmask 1040384   ;;  %v197_v42 = vmov 0.0  }
   0x5   :  { %vm71_vm0 = vcmp.eq.s32.totalorder %v51_v20, 0  ;;  %vm80_vm1 = vcmp.eq.s32.totalorder %v51_v20, 1  ;;  %vm89_vm2 = vcmp.eq.s32.totalorder %v51_v20, 2  ;;  %vm52_vm3 = vcmp.ge.s32.totalorder %v51_v20, 0  ;;  %50 = vst [vmem:[#allocation2] sm:$0x1] %v197_v42 }
   0x6   :  { %85 = vperm.xlu0 %160, %v82_v3   ;;  %v57_v8 = vmax.f32 %v56_v6, %v55_v7  ;;  %v119_v51 = vand.u32 127, %v118_v50  ;;  %s198_s1 = smov [#allocation2]  }
   0x7   :  { %s138_s25 = sshll.u32 %s198_s1, 4  ;;  %s139_s25 = int_to_ptr.vmem [resolvable:$true] %s138_s25 }
   0x8   :  { %v58_v9 = vsub.f32 %v53_v4, %v57_v8  ;;  %v59_v10 = vsub.f32 %v54_v5, %v57_v8  ;;  %v60_v12 = vsub.f32 %v55_v7, %v57_v8  ;;  %vm121_vm5 = vcmp.eq.s32.totalorder %v119_v51, 0  ;;  %s172_s26 = scalar_lea.vmem %s139_s25, 16  ;;  %s176_s27 = scalar_lea.vmem %s139_s25, 32 }
   0x9   :  { %p173_p0 = scmp.ne.s32.totalorder %s139_s25, %s172_s26  ;;  %p177_p1 = scmp.lt.s32.totalorder %s139_s25, %s139_s25 }
   0xa   :  { %v61_v11 = vmul.f32 1.442695, %v58_v9  ;;  %v63_v13 = vmul.f32 1.442695, %v59_v10  ;;  %v66_v14 = vmul.f32 1.442695, %v60_v12  ;;  %p178_p2 = scmp.lt.s32.totalorder %s176_s27, %s172_s26 }
   0xb   :  { %v72_v21 = vsel %vm71_vm0, %v58_v9, 0.0 }
   0xc   :  { %162 = vpow2.f32 %v61_v11  ;;  %v81_v23 = vsel %vm80_vm1, %v59_v10, %v72_v21  ;;  %v120_v52 = vld [vmem:[#allocation2] sm:$0x1]  ;;  %p179_p3 = por %p178_p2, %p177_p1 }
   0xd   :  { %164 = vpow2.f32 %v63_v13  ;;  %v90_v25 = vsel %vm89_vm2, %v60_v12, %v81_v23 }
   0xe   :  { %166 = vpow2.f32 %v66_v14  ;;  %p180_p4 = pnand %p179_p3, %p173_p0 }
  0x16   :  { %v163_v15 = vpop.eup %162 }
  0x17   :  { %v165_v16 = vpop.eup %164 }
  0x18   :  { %v65_v17 = vadd.f32 %v165_v16, %v163_v15  ;;  %v167_v18 = vpop.eup %166 }
  0x1a   :  { %v68_v19 = vadd.f32 %v167_v18, %v65_v17 }
  0x1c   :  { %168 = vlog2.f32 %v68_v19 }
  0x26   :  { %v169_v22 = vpop.eup %168 }
  0x27   :  { %v70_v24 = vmul.f32 0.6931472, %v169_v22 }
  0x29   :  { %v98_v26 = vsub.f32 %v90_v25, %v70_v24 }
  0x2b   :  { %v99_v27 = vmul.f32 1.442695, %v98_v26  ;;  %v104_v36 = vsub.f32 0.0, %v98_v26 }
  0x2d   :  { %170 = vpow2.f32 %v99_v27 }
  0x37   :  { %v171_v28 = vpop.eup %170 }
  0x38   :  { %v101_v29 = vsub.f32 1.0, %v171_v28 }
  0x3a   :  { %v102_v32 = vmul.f32 %v101_v29, %v101_v29 }
  0x81   :  { %v77_v30 = vpop.permute.xlu0 %76  ;;  %v95_v31 = vpop.permute.xlu1 %94 }
  0x82   :  { %v79_v33 = vsel %vm71_vm0, %v77_v30, 0.0 }
  0x85   :  { %v86_v34 = vpop.permute.xlu0 %85 }
  0x86   :  { %v88_v35 = vsel %vm80_vm1, %v86_v34, %v79_v33 }
  0x87   :  { %v97_v37 = vsel %vm89_vm2, %v95_v31, %v88_v35 }
  0x88   :  { %v103_v38 = vmul.f32 %v102_v32, %v97_v37 }
  0x8a   :  { %v105_v39 = vmul.f32 %v104_v36, %v103_v38 }
  0x8c   :  { %v106_v40 = vsel %vm52_vm3, %v105_v39, 0.0 }
  0x8d   :  { %v108_v41 = vsel %vm107_vm4, %v106_v40, 0.0 }
  0x8e   :  { %109 = vadd.xlane.f32.xlu1 %v108_v41 }
 0x11b   :  { %v110_v43 = vpop.xlane.xlu1 %109 }
 0x11c   :  { %v111_v44 = vrot.slane %v110_v43, 4 }
 0x11e   :  { %v112_v45 = vadd.f32 %v111_v44, %v110_v43 }
 0x120   :  { %v113_v46 = vrot.slane %v112_v45, 2 }
 0x122   :  { %v114_v47 = vadd.f32 %v113_v46, %v112_v45 }
 0x124   :  { %v115_v48 = vrot.slane %v114_v47, 1 }
 0x126   :  { %v116_v49 = vadd.f32 %v115_v48, %v114_v47 }
 0x128   :  { %155 = vpush %v116_v49 }
 0x159   :  { %s156_s0 = spop %155 }
 0x15a   :  { %v122_v53 = vstv %s156_s0 }
 0x15b   :  { %v123_v54 = vsel %vm121_vm5, %v122_v53, 0.0 }
 0x15c   :  { %v124_v55 = vadd.f32 %v123_v54, %v120_v52 }
 0x15e   :  { %125 = vst [vmem:[#allocation2] sm:$0x1] %v124_v55 }
 0x165   :  { %v129_v56 = vld [vmem:[#allocation2] sm:$0x1] }
 0x166   :  { %v130_v57 = vmul.f32 0.125, %v129_v56 }
 0x168   :  { %131 = vst [vmem:[#allocation2] sm:$0x1] %v130_v57 }
 0x169   :  { %183 = shalt.err (!%p180_p4)
}
 0x16a   :  { %s184_s30 = scalar_lea.hbm %s259_s3, 16 }
 0x16b   :  { %p185_p5 = scmp.ne.s32.totalorder %s259_s3, %s184_s30  ;;  %p188_p6 = scmp.lt.u32.totalorder %s184_s30, %s259_s3 }
 0x16d   :  { %p190_p7 = pnand %p188_p6, %p185_p5 }
 0x16f   :  { %193 = shalt.err (!%p190_p7)
}
 0x170   :  { %141 = dma.vmem_to_hbm [thread:$0]  %s139_s25, 16, %s259_s3, [#allocation3]  }
 0x171   :  { %194 = dma.done.wait [#allocation3], 16  }
 0x172   :  { %195 = vsyncadd [#allocation3], 4294967280 }
 0x173   :  { %145 = vsyncpa [#allocation3], 1 }

</bundles_post_ra>
